<compile_context>
chip_gen: v5e
topology: v5e:2x2
jax: 0.10.0
libtpu: 0.0.40
codegen_flags: <defaults>
</compile_context>

<pallas_src>
import jax
import jax.numpy as jnp
from jax.experimental import pallas as pl
from jax.experimental.pallas import tpu as pltpu

LEAKY_SLOPE = 0.01
BN_EPS = 1e-5
LANES = 128  # TPU lane width; all activations / params are padded to this.


# ------------------------------------------------------------------- kernel
def make_net_kernel(n_feat_layers):
    """Fused x||y network over lane-dense (B, 128) activations.

    Packed parameter layout:
      w_ref : (n_layers, 128, 128)  per-layer weight (zero-padded / block-diag)
      v_ref : (3*n_layers, 128)     rows [3i, 3i+1, 3i+2] = bias, gamma, beta
    Layer order: n_feat_layers feature layers, predict_*_1, 3x hidden_*_2,
    predict_*_2 (linear only).
    """

    def kernel(x_ref, w_ref, v_ref, out_ref):
        def bn_layer(h, li):
            # Point-of-use reads; each (1,128) vector is loaded exactly once.
            w = w_ref[li]
            b = v_ref[3 * li + 0:3 * li + 1, :]
            g = v_ref[3 * li + 1:3 * li + 2, :]
            bt = v_ref[3 * li + 2:3 * li + 3, :]
            z = jnp.dot(h, w, preferred_element_type=jnp.float32) + b
            z = jnp.maximum(z, LEAKY_SLOPE * z)            # LeakyReLU(0.01)
            # Single-pass batch statistics (training-mode BN, biased variance).
            inv_b = 1.0 / z.shape[0]
            mean = jnp.sum(z, axis=0, keepdims=True) * inv_b
            ex2 = jnp.sum(z * z, axis=0, keepdims=True) * inv_b
            var = jnp.maximum(ex2 - mean * mean, 0.0)      # clamp f32 cancellation
            # Fold BN affine into a single scale+shift: 2 VPU ops per element.
            a = g * jax.lax.rsqrt(var + BN_EPS)
            c = bt - mean * a
            return z * a + c

        x = x_ref[...]                                     # (B, 128) padded input
        li = 0
        h = x
        for _ in range(n_feat_layers):                     # features_* (fused x||y)
            h = bn_layer(h, li)
            li += 1
        h = h + bn_layer(x, li)                            # predict_*_1 (uses x3 cols)
        li += 1
        for _ in range(3):                                 # hidden_*_2
            h = bn_layer(h, li)
            li += 1
        w = w_ref[li]                                      # predict_*_2 (linear only)
        b = v_ref[3 * li:3 * li + 1, :]
        out_ref[...] = jnp.dot(h, w, preferred_element_type=jnp.float32) + b

    return kernel


# ------------------------------------------------- per-branch params (reference)
def init_branch_params(key, n_feat_rest, n_hidden, n_output):
    """PyTorch-style uniform(+-1/sqrt(fan_in)) Linear init; BN gamma=1, beta=0.
    Weights stored (in,out); biases/gamma/beta stored as (1,out)."""
    params = []

    def linear(k, fan_in, fan_out):
        k1, k2 = jax.random.split(k)
        bound = 1.0 / float(fan_in) ** 0.5
        W = jax.random.uniform(k1, (fan_in, fan_out), jnp.float32, -bound, bound)
        b = jax.random.uniform(k2, (1, fan_out), jnp.float32, -bound, bound)
        return W, b

    keys = iter(jax.random.split(key, 16))

    in_c = n_feat_rest
    for h in n_hidden:                                   # features_*
        W, b = linear(next(keys), in_c, h)
        params += [W, b, jnp.ones((1, h), jnp.float32), jnp.zeros((1, h), jnp.float32)]
        in_c = h

    h_last = n_hidden[-1]
    W, b = linear(next(keys), 3, h_last)                 # predict_*_1
    params += [W, b, jnp.ones((1, h_last), jnp.float32),
               jnp.zeros((1, h_last), jnp.float32)]

    for _ in range(3):                                   # hidden_*_2
        W, b = linear(next(keys), h_last, h_last)
        params += [W, b, jnp.ones((1, h_last), jnp.float32),
                   jnp.zeros((1, h_last), jnp.float32)]

    W, b = linear(next(keys), h_last, n_output)          # predict_*_2
    params += [W, b]
    return params


# ------------------------------------------------- host-side fusion + packing
def pack_fused_params(params_x, params_y, n_hidden, n_output, n_feature):
    """Pack both branches into two lane-dense VMEM slabs.

    Invariant: every pad column has a zero weight column, zero bias and zero
    gamma/beta, so it stays exactly zero through every stage of the kernel.
    """
    H = n_hidden[-1]
    L = len(n_hidden)
    assert 2 * max(max(n_hidden), n_output) <= LANES, (
        "fused width exceeds 128 lanes; split branches instead (see TODO)")
    assert n_feature <= LANES

    def zW():
        return jnp.zeros((LANES, LANES), jnp.float32)

    def zv():
        return jnp.zeros((1, LANES), jnp.float32)

    def embed_w(Wx, rx, cx, Wy, ry, cy):
        W = zW()
        W = W.at[rx:rx + Wx.shape[0], cx:cx + Wx.shape[1]].set(Wx)
        W = W.at[ry:ry + Wy.shape[0], cy:cy + Wy.shape[1]].set(Wy)
        return W

    def embed_v(vx, cx, vy, cy):
        v = zv()
        v = v.at[:, cx:cx + vx.shape[1]].set(vx)
        v = v.at[:, cy:cy + vy.shape[1]].set(vy)
        return v

    ix, iy = iter(params_x), iter(params_y)

    def take4(it):
        return next(it), next(it), next(it), next(it)

    Ws, Vs = [], []

    def add_bn_layer(px, py, rx, ry, cx, cy):
        Wx, bx, gx, btx = px
        Wy, by, gy, bty = py
        Ws.append(embed_w(Wx, rx, cx, Wy, ry, cy))
        Vs.append(embed_v(bx, cx, by, cy))
        Vs.append(embed_v(gx, cx, gy, cy))
        Vs.append(embed_v(btx, cx, bty, cy))

    # features_* layers: layer 0 reads xr (input cols 3..n_feature-1);
    # later layers are block-diagonal over the previous fused activation.
    prev = None
    for li, h in enumerate(n_hidden):
        px, py = take4(ix), take4(iy)
        if li == 0:
            rx, ry = 3, 3
        else:
            rx, ry = 0, prev
        add_bn_layer(px, py, rx, ry, 0, h)
        prev = h

    # predict_*_1: reads x3 (input cols 0..2).
    add_bn_layer(take4(ix), take4(iy), 0, 0, 0, H)

    # hidden_*_2: 3 block-diagonal layers.
    for _ in range(3):
        add_bn_layer(take4(ix), take4(iy), 0, H, 0, H)

    # predict_*_2: block-diagonal linear; output cols [0,n_output)=x, [n_output,2n)=y.
    Wx, bx = next(ix), next(ix)
    Wy, by = next(iy), next(iy)
    Ws.append(embed_w(Wx, 0, 0, Wy, H, n_output))
    Vs.append(embed_v(bx, 0, by, n_output))
    Vs.append(zv())
    Vs.append(zv())  # unused gamma/beta slots keep the stride-3 layout

    w_slab = jnp.stack(Ws, axis=0)            # (n_layers, 128, 128)
    vec_slab = jnp.concatenate(Vs, axis=0)    # (3*n_layers, 128)
    return w_slab, vec_slab


# --------------------------------------------------------------------- wrapper
def net_forward(inputs, params_x, params_y, n_hidden, n_output):
    B, n_feature = inputs.shape
    w_slab, vec_slab = pack_fused_params(params_x, params_y,
                                         n_hidden, n_output, n_feature)
    # Single lane-dense input operand; the x3 / xr split is encoded in the
    # zero rows of the first-stage weights.
    x_pad = jnp.pad(inputs, ((0, 0), (0, LANES - n_feature)))

    kernel = make_net_kernel(len(n_hidden))
    vspec = pl.BlockSpec(memory_space=pltpu.MemorySpace.VMEM)

    out = pl.pallas_call(
        kernel,
        out_shape=jax.ShapeDtypeStruct((B, LANES), jnp.float32),
        in_specs=[vspec, vspec, vspec],
        out_specs=vspec,
    )(x_pad, w_slab, vec_slab)

    return out[:, :n_output], out[:, n_output:2 * n_output]


# --------------------------------------------------------- pure-JAX reference
def _branch_ref(xr, x3, params, n_feat_layers):
    def lrelu(x):
        return jnp.where(x > 0, x, LEAKY_SLOPE * x)

    def bn(h, gamma, beta):
        mean = jnp.mean(h, axis=0, keepdims=True)
        var = jnp.mean((h - mean) ** 2, axis=0, keepdims=True)
        return (h - mean) * jax.lax.rsqrt(var + BN_EPS) * gamma + beta

    it = iter(params)
    h = xr
    for _ in range(n_feat_layers):
        W, b, g, bt = next(it), next(it), next(it), next(it)
        h = bn(lrelu(h @ W + b), g, bt)
    W, b, g, bt = next(it), next(it), next(it), next(it)
    h2 = bn(lrelu(x3 @ W + b), g, bt)
    h = h + h2
    for _ in range(3):
        W, b, g, bt = next(it), next(it), next(it), next(it)
        h = bn(lrelu(h @ W + b), g, bt)
    W, b = next(it), next(it)
    return h @ W + b


def net_forward_ref(inputs, params_x, params_y, n_hidden):
    x3 = inputs[:, :3]
    xr = inputs[:, 3:]
    n_feat_layers = len(n_hidden)
    return (_branch_ref(xr, x3, params_x, n_feat_layers),
            _branch_ref(xr, x3, params_y, n_feat_layers))


if __name__ == "__main__":
    B = 8
    n_feature = 9            # 3 pose features + 6 other features
    n_hidden = (32, 32)
    n_output = 2

    key = jax.random.PRNGKey(0)
    k_in, kx, ky = jax.random.split(key, 3)

    inputs = jax.random.normal(k_in, (B, n_feature), jnp.float32)
    params_x = init_branch_params(kx, n_feature - 3, n_hidden, n_output)
    params_y = init_branch_params(ky, n_feature - 3, n_hidden, n_output)

    outx, outy = net_forward(inputs, params_x, params_y, n_hidden, n_output)
    jax.block_until_ready((outx, outy))

    refx, refy = net_forward_ref(inputs, params_x, params_y, n_hidden)
    assert jnp.allclose(outx, refx, rtol=1e-3, atol=1e-3), "x branch mismatch"
    assert jnp.allclose(outy, refy, rtol=1e-3, atol=1e-3), "y branch mismatch"

    print("KERNEL_OK")
</pallas_src>

<mosaic_0001>
module attributes {stable_mosaic.version = 11 : i64} {
  func.func @kernel(%arg0: memref<8x128xf32, #tpu.memory_space<vmem>>, %arg1: memref<7x128x128xf32, #tpu.memory_space<vmem>>, %arg2: memref<21x128xf32, #tpu.memory_space<vmem>>, %arg3: memref<8x128xf32, #tpu.memory_space<vmem>>) attributes {dimension_semantics = [], scalar_prefetch = 0 : i64, scratch_operands = 0 : i64, tpu.core_type = #tpu.core_type<tc>} {
    %c0 = arith.constant 0 : index
    %c0_0 = arith.constant 0 : index
    %0 = vector.load %arg0[%c0, %c0_0] : memref<8x128xf32, #tpu.memory_space<vmem>>, vector<8x128xf32>
    %c0_1 = arith.constant 0 : index
    %c0_2 = arith.constant 0 : index
    %c0_3 = arith.constant 0 : index
    %1 = vector.load %arg1[%c0_1, %c0_2, %c0_3] : memref<7x128x128xf32, #tpu.memory_space<vmem>>, vector<1x128x128xf32>
    %2 = vector.shape_cast %1 : vector<1x128x128xf32> to vector<128x128xf32>
    %c0_4 = arith.constant 0 : index
    %c0_5 = arith.constant 0 : index
    %3 = vector.load %arg2[%c0_4, %c0_5] : memref<21x128xf32, #tpu.memory_space<vmem>>, vector<1x128xf32>
    %c1 = arith.constant 1 : index
    %c0_6 = arith.constant 0 : index
    %4 = vector.load %arg2[%c1, %c0_6] : memref<21x128xf32, #tpu.memory_space<vmem>>, vector<1x128xf32>
    %c2 = arith.constant 2 : index
    %c0_7 = arith.constant 0 : index
    %5 = vector.load %arg2[%c2, %c0_7] : memref<21x128xf32, #tpu.memory_space<vmem>>, vector<1x128xf32>
    %cst = arith.constant dense<0.000000e+00> : vector<8x128xf32>
    %6 = tpu.matmul %0, %2, %cst {dimension_numbers = #tpu.dot_dimension_numbers<[1], [0], [0], [1], [0, 0, 1, 1], [], []>} : vector<8x128xf32>, vector<128x128xf32>, vector<8x128xf32> -> vector<8x128xf32>
    %7 = vector.broadcast %3 : vector<1x128xf32> to vector<8x128xf32>
    %8 = arith.addf %6, %7 : vector<8x128xf32>
    %cst_8 = arith.constant 0.00999999977 : f32
    %9 = vector.broadcast %cst_8 : f32 to vector<8x128xf32>
    %10 = arith.mulf %9, %8 : vector<8x128xf32>
    %11 = arith.maximumf %8, %10 : vector<8x128xf32>
    %cst_9 = arith.constant dense<0.000000e+00> : vector<128xf32>
    %12 = vector.multi_reduction <add>, %11, %cst_9 [0] : vector<8x128xf32> to vector<128xf32>
    %13 = vector.shape_cast %12 : vector<128xf32> to vector<1x128xf32>
    %cst_10 = arith.constant 1.250000e-01 : f32
    %14 = vector.broadcast %cst_10 : f32 to vector<1x128xf32>
    %15 = arith.mulf %13, %14 : vector<1x128xf32>
    %16 = arith.mulf %11, %11 : vector<8x128xf32>
    %cst_11 = arith.constant dense<0.000000e+00> : vector<128xf32>
    %17 = vector.multi_reduction <add>, %16, %cst_11 [0] : vector<8x128xf32> to vector<128xf32>
    %18 = vector.shape_cast %17 : vector<128xf32> to vector<1x128xf32>
    %cst_12 = arith.constant 1.250000e-01 : f32
    %19 = vector.broadcast %cst_12 : f32 to vector<1x128xf32>
    %20 = arith.mulf %18, %19 : vector<1x128xf32>
    %21 = arith.mulf %15, %15 : vector<1x128xf32>
    %22 = arith.subf %20, %21 : vector<1x128xf32>
    %cst_13 = arith.constant 0.000000e+00 : f32
    %23 = vector.broadcast %cst_13 : f32 to vector<1x128xf32>
    %24 = arith.maximumf %22, %23 : vector<1x128xf32>
    %cst_14 = arith.constant 9.99999974E-6 : f32
    %25 = vector.broadcast %cst_14 : f32 to vector<1x128xf32>
    %26 = arith.addf %24, %25 : vector<1x128xf32>
    %27 = math.rsqrt %26 : vector<1x128xf32>
    %28 = arith.mulf %4, %27 : vector<1x128xf32>
    %29 = arith.mulf %15, %28 : vector<1x128xf32>
    %30 = arith.subf %5, %29 : vector<1x128xf32>
    %31 = vector.broadcast %28 : vector<1x128xf32> to vector<8x128xf32>
    %32 = arith.mulf %11, %31 : vector<8x128xf32>
    %33 = vector.broadcast %30 : vector<1x128xf32> to vector<8x128xf32>
    %34 = arith.addf %32, %33 : vector<8x128xf32>
    %c1_15 = arith.constant 1 : index
    %c0_16 = arith.constant 0 : index
    %c0_17 = arith.constant 0 : index
    %35 = vector.load %arg1[%c1_15, %c0_16, %c0_17] : memref<7x128x128xf32, #tpu.memory_space<vmem>>, vector<1x128x128xf32>
    %36 = vector.shape_cast %35 : vector<1x128x128xf32> to vector<128x128xf32>
    %c3 = arith.constant 3 : index
    %c0_18 = arith.constant 0 : index
    %37 = vector.load %arg2[%c3, %c0_18] : memref<21x128xf32, #tpu.memory_space<vmem>>, vector<1x128xf32>
    %c4 = arith.constant 4 : index
    %c0_19 = arith.constant 0 : index
    %38 = vector.load %arg2[%c4, %c0_19] : memref<21x128xf32, #tpu.memory_space<vmem>>, vector<1x128xf32>
    %c5 = arith.constant 5 : index
    %c0_20 = arith.constant 0 : index
    %39 = vector.load %arg2[%c5, %c0_20] : memref<21x128xf32, #tpu.memory_space<vmem>>, vector<1x128xf32>
    %cst_21 = arith.constant dense<0.000000e+00> : vector<8x128xf32>
    %40 = tpu.matmul %34, %36, %cst_21 {dimension_numbers = #tpu.dot_dimension_numbers<[1], [0], [0], [1], [0, 0, 1, 1], [], []>} : vector<8x128xf32>, vector<128x128xf32>, vector<8x128xf32> -> vector<8x128xf32>
    %41 = vector.broadcast %37 : vector<1x128xf32> to vector<8x128xf32>
    %42 = arith.addf %40, %41 : vector<8x128xf32>
    %cst_22 = arith.constant 0.00999999977 : f32
    %43 = vector.broadcast %cst_22 : f32 to vector<8x128xf32>
    %44 = arith.mulf %43, %42 : vector<8x128xf32>
    %45 = arith.maximumf %42, %44 : vector<8x128xf32>
    %cst_23 = arith.constant dense<0.000000e+00> : vector<128xf32>
    %46 = vector.multi_reduction <add>, %45, %cst_23 [0] : vector<8x128xf32> to vector<128xf32>
    %47 = vector.shape_cast %46 : vector<128xf32> to vector<1x128xf32>
    %cst_24 = arith.constant 1.250000e-01 : f32
    %48 = vector.broadcast %cst_24 : f32 to vector<1x128xf32>
    %49 = arith.mulf %47, %48 : vector<1x128xf32>
    %50 = arith.mulf %45, %45 : vector<8x128xf32>
    %cst_25 = arith.constant dense<0.000000e+00> : vector<128xf32>
    %51 = vector.multi_reduction <add>, %50, %cst_25 [0] : vector<8x128xf32> to vector<128xf32>
    %52 = vector.shape_cast %51 : vector<128xf32> to vector<1x128xf32>
    %cst_26 = arith.constant 1.250000e-01 : f32
    %53 = vector.broadcast %cst_26 : f32 to vector<1x128xf32>
    %54 = arith.mulf %52, %53 : vector<1x128xf32>
    %55 = arith.mulf %49, %49 : vector<1x128xf32>
    %56 = arith.subf %54, %55 : vector<1x128xf32>
    %cst_27 = arith.constant 0.000000e+00 : f32
    %57 = vector.broadcast %cst_27 : f32 to vector<1x128xf32>
    %58 = arith.maximumf %56, %57 : vector<1x128xf32>
    %cst_28 = arith.constant 9.99999974E-6 : f32
    %59 = vector.broadcast %cst_28 : f32 to vector<1x128xf32>
    %60 = arith.addf %58, %59 : vector<1x128xf32>
    %61 = math.rsqrt %60 : vector<1x128xf32>
    %62 = arith.mulf %38, %61 : vector<1x128xf32>
    %63 = arith.mulf %49, %62 : vector<1x128xf32>
    %64 = arith.subf %39, %63 : vector<1x128xf32>
    %65 = vector.broadcast %62 : vector<1x128xf32> to vector<8x128xf32>
    %66 = arith.mulf %45, %65 : vector<8x128xf32>
    %67 = vector.broadcast %64 : vector<1x128xf32> to vector<8x128xf32>
    %68 = arith.addf %66, %67 : vector<8x128xf32>
    %c2_29 = arith.constant 2 : index
    %c0_30 = arith.constant 0 : index
    %c0_31 = arith.constant 0 : index
    %69 = vector.load %arg1[%c2_29, %c0_30, %c0_31] : memref<7x128x128xf32, #tpu.memory_space<vmem>>, vector<1x128x128xf32>
    %70 = vector.shape_cast %69 : vector<1x128x128xf32> to vector<128x128xf32>
    %c6 = arith.constant 6 : index
    %c0_32 = arith.constant 0 : index
    %71 = vector.load %arg2[%c6, %c0_32] : memref<21x128xf32, #tpu.memory_space<vmem>>, vector<1x128xf32>
    %c7 = arith.constant 7 : index
    %c0_33 = arith.constant 0 : index
    %72 = vector.load %arg2[%c7, %c0_33] : memref<21x128xf32, #tpu.memory_space<vmem>>, vector<1x128xf32>
    %c8 = arith.constant 8 : index
    %c0_34 = arith.constant 0 : index
    %73 = vector.load %arg2[%c8, %c0_34] : memref<21x128xf32, #tpu.memory_space<vmem>>, vector<1x128xf32>
    %cst_35 = arith.constant dense<0.000000e+00> : vector<8x128xf32>
    %74 = tpu.matmul %0, %70, %cst_35 {dimension_numbers = #tpu.dot_dimension_numbers<[1], [0], [0], [1], [0, 0, 1, 1], [], []>} : vector<8x128xf32>, vector<128x128xf32>, vector<8x128xf32> -> vector<8x128xf32>
    %75 = vector.broadcast %71 : vector<1x128xf32> to vector<8x128xf32>
    %76 = arith.addf %74, %75 : vector<8x128xf32>
    %cst_36 = arith.constant 0.00999999977 : f32
    %77 = vector.broadcast %cst_36 : f32 to vector<8x128xf32>
    %78 = arith.mulf %77, %76 : vector<8x128xf32>
    %79 = arith.maximumf %76, %78 : vector<8x128xf32>
    %cst_37 = arith.constant dense<0.000000e+00> : vector<128xf32>
    %80 = vector.multi_reduction <add>, %79, %cst_37 [0] : vector<8x128xf32> to vector<128xf32>
    %81 = vector.shape_cast %80 : vector<128xf32> to vector<1x128xf32>
    %cst_38 = arith.constant 1.250000e-01 : f32
    %82 = vector.broadcast %cst_38 : f32 to vector<1x128xf32>
    %83 = arith.mulf %81, %82 : vector<1x128xf32>
    %84 = arith.mulf %79, %79 : vector<8x128xf32>
    %cst_39 = arith.constant dense<0.000000e+00> : vector<128xf32>
    %85 = vector.multi_reduction <add>, %84, %cst_39 [0] : vector<8x128xf32> to vector<128xf32>
    %86 = vector.shape_cast %85 : vector<128xf32> to vector<1x128xf32>
    %cst_40 = arith.constant 1.250000e-01 : f32
    %87 = vector.broadcast %cst_40 : f32 to vector<1x128xf32>
    %88 = arith.mulf %86, %87 : vector<1x128xf32>
    %89 = arith.mulf %83, %83 : vector<1x128xf32>
    %90 = arith.subf %88, %89 : vector<1x128xf32>
    %cst_41 = arith.constant 0.000000e+00 : f32
    %91 = vector.broadcast %cst_41 : f32 to vector<1x128xf32>
    %92 = arith.maximumf %90, %91 : vector<1x128xf32>
    %cst_42 = arith.constant 9.99999974E-6 : f32
    %93 = vector.broadcast %cst_42 : f32 to vector<1x128xf32>
    %94 = arith.addf %92, %93 : vector<1x128xf32>
    %95 = math.rsqrt %94 : vector<1x128xf32>
    %96 = arith.mulf %72, %95 : vector<1x128xf32>
    %97 = arith.mulf %83, %96 : vector<1x128xf32>
    %98 = arith.subf %73, %97 : vector<1x128xf32>
    %99 = vector.broadcast %96 : vector<1x128xf32> to vector<8x128xf32>
    %100 = arith.mulf %79, %99 : vector<8x128xf32>
    %101 = vector.broadcast %98 : vector<1x128xf32> to vector<8x128xf32>
    %102 = arith.addf %100, %101 : vector<8x128xf32>
    %103 = arith.addf %68, %102 : vector<8x128xf32>
    %c3_43 = arith.constant 3 : index
    %c0_44 = arith.constant 0 : index
    %c0_45 = arith.constant 0 : index
    %104 = vector.load %arg1[%c3_43, %c0_44, %c0_45] : memref<7x128x128xf32, #tpu.memory_space<vmem>>, vector<1x128x128xf32>
    %105 = vector.shape_cast %104 : vector<1x128x128xf32> to vector<128x128xf32>
    %c9 = arith.constant 9 : index
    %c0_46 = arith.constant 0 : index
    %106 = vector.load %arg2[%c9, %c0_46] : memref<21x128xf32, #tpu.memory_space<vmem>>, vector<1x128xf32>
    %c10 = arith.constant 10 : index
    %c0_47 = arith.constant 0 : index
    %107 = vector.load %arg2[%c10, %c0_47] : memref<21x128xf32, #tpu.memory_space<vmem>>, vector<1x128xf32>
    %c11 = arith.constant 11 : index
    %c0_48 = arith.constant 0 : index
    %108 = vector.load %arg2[%c11, %c0_48] : memref<21x128xf32, #tpu.memory_space<vmem>>, vector<1x128xf32>
    %cst_49 = arith.constant dense<0.000000e+00> : vector<8x128xf32>
    %109 = tpu.matmul %103, %105, %cst_49 {dimension_numbers = #tpu.dot_dimension_numbers<[1], [0], [0], [1], [0, 0, 1, 1], [], []>} : vector<8x128xf32>, vector<128x128xf32>, vector<8x128xf32> -> vector<8x128xf32>
    %110 = vector.broadcast %106 : vector<1x128xf32> to vector<8x128xf32>
    %111 = arith.addf %109, %110 : vector<8x128xf32>
    %cst_50 = arith.constant 0.00999999977 : f32
    %112 = vector.broadcast %cst_50 : f32 to vector<8x128xf32>
    %113 = arith.mulf %112, %111 : vector<8x128xf32>
    %114 = arith.maximumf %111, %113 : vector<8x128xf32>
    %cst_51 = arith.constant dense<0.000000e+00> : vector<128xf32>
    %115 = vector.multi_reduction <add>, %114, %cst_51 [0] : vector<8x128xf32> to vector<128xf32>
    %116 = vector.shape_cast %115 : vector<128xf32> to vector<1x128xf32>
    %cst_52 = arith.constant 1.250000e-01 : f32
    %117 = vector.broadcast %cst_52 : f32 to vector<1x128xf32>
    %118 = arith.mulf %116, %117 : vector<1x128xf32>
    %119 = arith.mulf %114, %114 : vector<8x128xf32>
    %cst_53 = arith.constant dense<0.000000e+00> : vector<128xf32>
    %120 = vector.multi_reduction <add>, %119, %cst_53 [0] : vector<8x128xf32> to vector<128xf32>
    %121 = vector.shape_cast %120 : vector<128xf32> to vector<1x128xf32>
    %cst_54 = arith.constant 1.250000e-01 : f32
    %122 = vector.broadcast %cst_54 : f32 to vector<1x128xf32>
    %123 = arith.mulf %121, %122 : vector<1x128xf32>
    %124 = arith.mulf %118, %118 : vector<1x128xf32>
    %125 = arith.subf %123, %124 : vector<1x128xf32>
    %cst_55 = arith.constant 0.000000e+00 : f32
    %126 = vector.broadcast %cst_55 : f32 to vector<1x128xf32>
    %127 = arith.maximumf %125, %126 : vector<1x128xf32>
    %cst_56 = arith.constant 9.99999974E-6 : f32
    %128 = vector.broadcast %cst_56 : f32 to vector<1x128xf32>
    %129 = arith.addf %127, %128 : vector<1x128xf32>
    %130 = math.rsqrt %129 : vector<1x128xf32>
    %131 = arith.mulf %107, %130 : vector<1x128xf32>
    %132 = arith.mulf %118, %131 : vector<1x128xf32>
    %133 = arith.subf %108, %132 : vector<1x128xf32>
    %134 = vector.broadcast %131 : vector<1x128xf32> to vector<8x128xf32>
    %135 = arith.mulf %114, %134 : vector<8x128xf32>
    %136 = vector.broadcast %133 : vector<1x128xf32> to vector<8x128xf32>
    %137 = arith.addf %135, %136 : vector<8x128xf32>
    %c4_57 = arith.constant 4 : index
    %c0_58 = arith.constant 0 : index
    %c0_59 = arith.constant 0 : index
    %138 = vector.load %arg1[%c4_57, %c0_58, %c0_59] : memref<7x128x128xf32, #tpu.memory_space<vmem>>, vector<1x128x128xf32>
    %139 = vector.shape_cast %138 : vector<1x128x128xf32> to vector<128x128xf32>
    %c12 = arith.constant 12 : index
    %c0_60 = arith.constant 0 : index
    %140 = vector.load %arg2[%c12, %c0_60] : memref<21x128xf32, #tpu.memory_space<vmem>>, vector<1x128xf32>
    %c13 = arith.constant 13 : index
    %c0_61 = arith.constant 0 : index
    %141 = vector.load %arg2[%c13, %c0_61] : memref<21x128xf32, #tpu.memory_space<vmem>>, vector<1x128xf32>
    %c14 = arith.constant 14 : index
    %c0_62 = arith.constant 0 : index
    %142 = vector.load %arg2[%c14, %c0_62] : memref<21x128xf32, #tpu.memory_space<vmem>>, vector<1x128xf32>
    %cst_63 = arith.constant dense<0.000000e+00> : vector<8x128xf32>
    %143 = tpu.matmul %137, %139, %cst_63 {dimension_numbers = #tpu.dot_dimension_numbers<[1], [0], [0], [1], [0, 0, 1, 1], [], []>} : vector<8x128xf32>, vector<128x128xf32>, vector<8x128xf32> -> vector<8x128xf32>
    %144 = vector.broadcast %140 : vector<1x128xf32> to vector<8x128xf32>
    %145 = arith.addf %143, %144 : vector<8x128xf32>
    %cst_64 = arith.constant 0.00999999977 : f32
    %146 = vector.broadcast %cst_64 : f32 to vector<8x128xf32>
    %147 = arith.mulf %146, %145 : vector<8x128xf32>
    %148 = arith.maximumf %145, %147 : vector<8x128xf32>
    %cst_65 = arith.constant dense<0.000000e+00> : vector<128xf32>
    %149 = vector.multi_reduction <add>, %148, %cst_65 [0] : vector<8x128xf32> to vector<128xf32>
    %150 = vector.shape_cast %149 : vector<128xf32> to vector<1x128xf32>
    %cst_66 = arith.constant 1.250000e-01 : f32
    %151 = vector.broadcast %cst_66 : f32 to vector<1x128xf32>
    %152 = arith.mulf %150, %151 : vector<1x128xf32>
    %153 = arith.mulf %148, %148 : vector<8x128xf32>
    %cst_67 = arith.constant dense<0.000000e+00> : vector<128xf32>
    %154 = vector.multi_reduction <add>, %153, %cst_67 [0] : vector<8x128xf32> to vector<128xf32>
    %155 = vector.shape_cast %154 : vector<128xf32> to vector<1x128xf32>
    %cst_68 = arith.constant 1.250000e-01 : f32
    %156 = vector.broadcast %cst_68 : f32 to vector<1x128xf32>
    %157 = arith.mulf %155, %156 : vector<1x128xf32>
    %158 = arith.mulf %152, %152 : vector<1x128xf32>
    %159 = arith.subf %157, %158 : vector<1x128xf32>
    %cst_69 = arith.constant 0.000000e+00 : f32
    %160 = vector.broadcast %cst_69 : f32 to vector<1x128xf32>
    %161 = arith.maximumf %159, %160 : vector<1x128xf32>
    %cst_70 = arith.constant 9.99999974E-6 : f32
    %162 = vector.broadcast %cst_70 : f32 to vector<1x128xf32>
    %163 = arith.addf %161, %162 : vector<1x128xf32>
    %164 = math.rsqrt %163 : vector<1x128xf32>
    %165 = arith.mulf %141, %164 : vector<1x128xf32>
    %166 = arith.mulf %152, %165 : vector<1x128xf32>
    %167 = arith.subf %142, %166 : vector<1x128xf32>
    %168 = vector.broadcast %165 : vector<1x128xf32> to vector<8x128xf32>
    %169 = arith.mulf %148, %168 : vector<8x128xf32>
    %170 = vector.broadcast %167 : vector<1x128xf32> to vector<8x128xf32>
    %171 = arith.addf %169, %170 : vector<8x128xf32>
    %c5_71 = arith.constant 5 : index
    %c0_72 = arith.constant 0 : index
    %c0_73 = arith.constant 0 : index
    %172 = vector.load %arg1[%c5_71, %c0_72, %c0_73] : memref<7x128x128xf32, #tpu.memory_space<vmem>>, vector<1x128x128xf32>
    %173 = vector.shape_cast %172 : vector<1x128x128xf32> to vector<128x128xf32>
    %c15 = arith.constant 15 : index
    %c0_74 = arith.constant 0 : index
    %174 = vector.load %arg2[%c15, %c0_74] : memref<21x128xf32, #tpu.memory_space<vmem>>, vector<1x128xf32>
    %c16 = arith.constant 16 : index
    %c0_75 = arith.constant 0 : index
    %175 = vector.load %arg2[%c16, %c0_75] : memref<21x128xf32, #tpu.memory_space<vmem>>, vector<1x128xf32>
    %c17 = arith.constant 17 : index
    %c0_76 = arith.constant 0 : index
    %176 = vector.load %arg2[%c17, %c0_76] : memref<21x128xf32, #tpu.memory_space<vmem>>, vector<1x128xf32>
    %cst_77 = arith.constant dense<0.000000e+00> : vector<8x128xf32>
    %177 = tpu.matmul %171, %173, %cst_77 {dimension_numbers = #tpu.dot_dimension_numbers<[1], [0], [0], [1], [0, 0, 1, 1], [], []>} : vector<8x128xf32>, vector<128x128xf32>, vector<8x128xf32> -> vector<8x128xf32>
    %178 = vector.broadcast %174 : vector<1x128xf32> to vector<8x128xf32>
    %179 = arith.addf %177, %178 : vector<8x128xf32>
    %cst_78 = arith.constant 0.00999999977 : f32
    %180 = vector.broadcast %cst_78 : f32 to vector<8x128xf32>
    %181 = arith.mulf %180, %179 : vector<8x128xf32>
    %182 = arith.maximumf %179, %181 : vector<8x128xf32>
    %cst_79 = arith.constant dense<0.000000e+00> : vector<128xf32>
    %183 = vector.multi_reduction <add>, %182, %cst_79 [0] : vector<8x128xf32> to vector<128xf32>
    %184 = vector.shape_cast %183 : vector<128xf32> to vector<1x128xf32>
    %cst_80 = arith.constant 1.250000e-01 : f32
    %185 = vector.broadcast %cst_80 : f32 to vector<1x128xf32>
    %186 = arith.mulf %184, %185 : vector<1x128xf32>
    %187 = arith.mulf %182, %182 : vector<8x128xf32>
    %cst_81 = arith.constant dense<0.000000e+00> : vector<128xf32>
    %188 = vector.multi_reduction <add>, %187, %cst_81 [0] : vector<8x128xf32> to vector<128xf32>
    %189 = vector.shape_cast %188 : vector<128xf32> to vector<1x128xf32>
    %cst_82 = arith.constant 1.250000e-01 : f32
    %190 = vector.broadcast %cst_82 : f32 to vector<1x128xf32>
    %191 = arith.mulf %189, %190 : vector<1x128xf32>
    %192 = arith.mulf %186, %186 : vector<1x128xf32>
    %193 = arith.subf %191, %192 : vector<1x128xf32>
    %cst_83 = arith.constant 0.000000e+00 : f32
    %194 = vector.broadcast %cst_83 : f32 to vector<1x128xf32>
    %195 = arith.maximumf %193, %194 : vector<1x128xf32>
    %cst_84 = arith.constant 9.99999974E-6 : f32
    %196 = vector.broadcast %cst_84 : f32 to vector<1x128xf32>
    %197 = arith.addf %195, %196 : vector<1x128xf32>
    %198 = math.rsqrt %197 : vector<1x128xf32>
    %199 = arith.mulf %175, %198 : vector<1x128xf32>
    %200 = arith.mulf %186, %199 : vector<1x128xf32>
    %201 = arith.subf %176, %200 : vector<1x128xf32>
    %202 = vector.broadcast %199 : vector<1x128xf32> to vector<8x128xf32>
    %203 = arith.mulf %182, %202 : vector<8x128xf32>
    %204 = vector.broadcast %201 : vector<1x128xf32> to vector<8x128xf32>
    %205 = arith.addf %203, %204 : vector<8x128xf32>
    %c6_85 = arith.constant 6 : index
    %c0_86 = arith.constant 0 : index
    %c0_87 = arith.constant 0 : index
    %206 = vector.load %arg1[%c6_85, %c0_86, %c0_87] : memref<7x128x128xf32, #tpu.memory_space<vmem>>, vector<1x128x128xf32>
    %207 = vector.shape_cast %206 : vector<1x128x128xf32> to vector<128x128xf32>
    %c18 = arith.constant 18 : index
    %c0_88 = arith.constant 0 : index
    %208 = vector.load %arg2[%c18, %c0_88] : memref<21x128xf32, #tpu.memory_space<vmem>>, vector<1x128xf32>
    %cst_89 = arith.constant dense<0.000000e+00> : vector<8x128xf32>
    %209 = tpu.matmul %205, %207, %cst_89 {dimension_numbers = #tpu.dot_dimension_numbers<[1], [0], [0], [1], [0, 0, 1, 1], [], []>} : vector<8x128xf32>, vector<128x128xf32>, vector<8x128xf32> -> vector<8x128xf32>
    %210 = vector.broadcast %208 : vector<1x128xf32> to vector<8x128xf32>
    %211 = arith.addf %209, %210 : vector<8x128xf32>
    %c0_90 = arith.constant 0 : index
    %c0_91 = arith.constant 0 : index
    %212 = vector.load %arg3[%c0_90, %c0_91] : memref<8x128xf32, #tpu.memory_space<vmem>>, vector<8x128xf32>
    tpu.vector_store %arg3[%c0_90, %c0_91], %211 {strides = array<i32>} : memref<8x128xf32, #tpu.memory_space<vmem>>, vector<8x128xf32>,
    return
  }
}

</mosaic_0001>

<bundles_post_ra>
// kernel: tpu_custom_call.1
= control target key start
LH: loop header
LB: loop body
LE: loop exit
PB: predicated region body
PF: predicated region fallthrough
CT: control target
= control target key end

     0   :  { %8 = vsyncpa [#allocation3], 0  ;;  %s777_s0 = inlined_call_operand.hbm [shape: f32[8,128], index: 0, kind: input, shape index: {}]   ;;  %s778_s1 = inlined_call_operand.hbm [shape: f32[7,128,128], index: 1, kind: input, shape index: {}]   ;;  %s779_s2 = inlined_call_operand.hbm [shape: f32[21,128], index: 2, kind: input, shape index: {}]   ;;  %s780_s3 = inlined_call_operand.hbm [shape: f32[8,128], index: 3, kind: output, shape index: {}]  }
   0x1   :  { %9 = vsyncpa [#allocation6], 0  ;;  %s26_s14 = sshll.u32 %s778_s1, 4  ;;  %s27_s14 = int_to_ptr.hbm [resolvable:$true] %s26_s14 }
   0x2   :  { %10 = vsyncpa [#allocation4], 0  ;;  %s720_s15 = smov [#allocation5]   ;;  %s16_s19 = sshll.u32 %s777_s0, 4  ;;  %s17_s19 = int_to_ptr.hbm [resolvable:$true] %s16_s19 }
   0x3   :  { %s28_s16 = sshll.u32 %s720_s15, 4  ;;  %s721_s20 = smov 128   ;;  %s29_s16 = int_to_ptr.vmem [resolvable:$true] %s28_s16 }
   0x4   :  { %s722_s21 = smov 8   ;;  %s723_s22 = smov [#allocation2]  }
   0x5   :  { %34 = dma.hbm_to_vmem [thread:$0]  %s27_s14, 14336, %s29_s16, [#allocation6], %s721_s20, %s721_s20, %s722_s21  }
   0x6   :  { %s18_s23 = sshll.u32 %s723_s22, 4  ;;  %s39_s26 = sshll.u32 %s779_s2, 4  ;;  %s19_s23 = int_to_ptr.vmem [resolvable:$true] %s18_s23  ;;  %s40_s26 = int_to_ptr.hbm [resolvable:$true] %s39_s26 }
   0x7   :  { %21 = dma.hbm_to_vmem [thread:$0]  %s17_s19, 128, %s19_s23, [#allocation3]  }
   0x8   :  { %s724_s1 = smov [#allocation7]  }
   0x9   :  { %s41_s27 = sshll.u32 %s724_s1, 4  ;;  %s42_s27 = int_to_ptr.vmem [resolvable:$true] %s41_s27 }
   0xa   :  { %47 = dma.hbm_to_vmem [thread:$0]  %s40_s26, 384, %s42_s27, [#allocation6], %s721_s20, %s721_s20, %s722_s21  }
   0xb   :  { %714 = dma.done.wait [#allocation3], 128  }
   0xc   :  { %715 = vsyncadd [#allocation3], 4294967168 }
   0xd   :  { %716 = dma.done.wait [#allocation6], 14720  }
   0xe   :  { %717 = vsyncadd [#allocation6], 4294952576  ;;  %v76_v0 = vld [vmem:[#allocation5 + $0x78] sm:$0xff]  ;;  %v75_v1 = vld [vmem:[#allocation5 + $0x70] sm:$0xff]  ;;  %s725_s0 = smov [#allocation8]   ;;  %s582_s30 = sshll.u32 %s780_s3, 4  ;;  %s583_s30 = int_to_ptr.hbm [resolvable:$true] %s582_s30 }
   0xf   :  { %81 = vmatpush.msra.mxu0 %v76_v0  ;;  %v74_v2 = vld [vmem:[#allocation5 + $0x68] sm:$0xff]  ;;  %v73_v3 = vld [vmem:[#allocation5 + $0x60] sm:$0xff]  ;;  %v234_v4 = vld [vmem:[#allocation5 + $0x178] sm:$0xff]  ;;  %s580_s2 = sshll.u32 %s725_s0, 4  ;;  %s581_s2 = int_to_ptr.vmem [resolvable:$true] %s580_s2 }
  0x10   :  { %v72_v5 = vld [vmem:[#allocation5 + $0x58] sm:$0xff]  ;;  %239 = vmatpush.msra.mxu2 %v234_v4  ;;  %v233_v6 = vld [vmem:[#allocation5 + $0x170] sm:$0xff]  ;;  %v232_v7 = vld [vmem:[#allocation5 + $0x168] sm:$0xff] }
  0x11   :  { %82 = vmatpush.msra.mxu0 %v75_v1  ;;  %v71_v8 = vld [vmem:[#allocation5 + $0x50] sm:$0xff]  ;;  %v70_v9 = vld [vmem:[#allocation5 + $0x48] sm:$0xff]  ;;  %v231_v10 = vld [vmem:[#allocation5 + $0x160] sm:$0xff] }
  0x12   :  { %240 = vmatpush.msra.mxu2 %v233_v6  ;;  %v69_v11 = vld [vmem:[#allocation5 + $0x40] sm:$0xff]  ;;  %v230_v12 = vld [vmem:[#allocation5 + $0x158] sm:$0xff]  ;;  %v229_v13 = vld [vmem:[#allocation5 + $0x150] sm:$0xff] }
  0x13   :  { %83 = vmatpush.msra.mxu0 %v74_v2  ;;  %v68_v14 = vld [vmem:[#allocation5 + $0x38] sm:$0xff]  ;;  %v228_v15 = vld [vmem:[#allocation5 + $0x148] sm:$0xff]  ;;  %v67_v16 = vld [vmem:[#allocation5 + $0x30] sm:$0xff] }
  0x14   :  { %241 = vmatpush.msra.mxu2 %v232_v7  ;;  %v227_v17 = vld [vmem:[#allocation5 + $0x140] sm:$0xff]  ;;  %v66_v18 = vld [vmem:[#allocation5 + $0x28] sm:$0xff]  ;;  %v226_v19 = vld [vmem:[#allocation5 + $0x138] sm:$0xff] }
  0x15   :  { %84 = vmatpush.msra.mxu0 %v73_v3  ;;  %v65_v20 = vld [vmem:[#allocation5 + $0x20] sm:$0xff]  ;;  %v225_v21 = vld [vmem:[#allocation5 + $0x130] sm:$0xff]  ;;  %v64_v22 = vld [vmem:[#allocation5 + $0x18] sm:$0xff] }
  0x16   :  { %242 = vmatpush.msra.mxu2 %v231_v10  ;;  %v224_v23 = vld [vmem:[#allocation5 + $0x128] sm:$0xff]  ;;  %v63_v24 = vld [vmem:[#allocation5 + $0x10] sm:$0xff]  ;;  %v223_v25 = vld [vmem:[#allocation5 + $0x120] sm:$0xff] }
  0x17   :  { %85 = vmatpush.msra.mxu0 %v72_v5  ;;  %v62_v26 = vld [vmem:[#allocation5 + $0x8] sm:$0xff]  ;;  %v222_v27 = vld [vmem:[#allocation5 + $0x118] sm:$0xff]  ;;  %v61_v28 = vld [vmem:[#allocation5] sm:$0xff] }
  0x18   :  { %243 = vmatpush.msra.mxu2 %v230_v12  ;;  %v60_v29 = vld [vmem:[#allocation2] sm:$0xff]  ;;  %v221_v30 = vld [vmem:[#allocation5 + $0x110] sm:$0xff]  ;;  %v220_v31 = vld [vmem:[#allocation5 + $0x108] sm:$0xff] }
  0x19   :  { %86 = vmatpush.msra.mxu0 %v71_v8  ;;  %v219_v32 = vld [vmem:[#allocation5 + $0x100] sm:$0xff]  ;;  %v155_v33 = vld [vmem:[#allocation5 + $0xf8] sm:$0xff]  ;;  %v154_v34 = vld [vmem:[#allocation5 + $0xf0] sm:$0xff] }
  0x1a   :  { %244 = vmatpush.msra.mxu2 %v229_v13  ;;  %160 = vmatpush.msra.mxu1 %v155_v33  ;;  %v153_v35 = vld [vmem:[#allocation5 + $0xe8] sm:$0xff]  ;;  %v152_v36 = vld [vmem:[#allocation5 + $0xe0] sm:$0xff]  ;;  %v151_v37 = vld [vmem:[#allocation5 + $0xd8] sm:$0xff] }
  0x1b   :  { %87 = vmatpush.msra.mxu0 %v70_v9  ;;  %v150_v38 = vld [vmem:[#allocation5 + $0xd0] sm:$0xff]  ;;  %v149_v39 = vld [vmem:[#allocation5 + $0xc8] sm:$0xff]  ;;  %v148_v40 = vld [vmem:[#allocation5 + $0xc0] sm:$0xff] }
  0x1c   :  { %245 = vmatpush.msra.mxu2 %v228_v15  ;;  %161 = vmatpush.msra.mxu1 %v154_v34  ;;  %v599_v41 = vld [vmem:[#allocation7] ss:$0 sm:$0xff]  ;;  %v147_v42 = vld [vmem:[#allocation5 + $0xb8] sm:$0xff]  ;;  %v146_v43 = vld [vmem:[#allocation5 + $0xb0] sm:$0xff] }
  0x1d   :  { %88 = vmatpush.msra.mxu0 %v69_v11  ;;  %v145_v46 = vld [vmem:[#allocation5 + $0xa8] sm:$0xff]  ;;  %v144_v48 = vld [vmem:[#allocation5 + $0xa0] sm:$0xff]  ;;  %v143_v50 = vld [vmem:[#allocation5 + $0x98] sm:$0xff] }
  0x1e   :  { %246 = vmatpush.msra.mxu2 %v227_v17  ;;  %162 = vmatpush.msra.mxu1 %v153_v35  ;;  %v142_v53 = vld [vmem:[#allocation5 + $0x90] sm:$0xff]  ;;  %v141_v56 = vld [vmem:[#allocation5 + $0x88] sm:$0xff]  ;;  %v140_v58 = vld [vmem:[#allocation5 + $0x80] sm:$0xff] }
  0x1f   :  { %89 = vmatpush.msra.mxu0 %v68_v14  ;;  %v78_v14 = vld [vmem:[#allocation7 + $0x1] sm:$0x1] }
  0x20   :  { %247 = vmatpush.msra.mxu2 %v226_v19  ;;  %163 = vmatpush.msra.mxu1 %v152_v36 }
  0x21   :  { %90 = vmatpush.msra.mxu0 %v67_v16 }
  0x22   :  { %248 = vmatpush.msra.mxu2 %v225_v21  ;;  %164 = vmatpush.msra.mxu1 %v151_v37 }
  0x23   :  { %91 = vmatpush.msra.mxu0 %v66_v18  ;;  %v79_v18 = vld [vmem:[#allocation7 + $0x2] sm:$0x1] }
  0x24   :  { %249 = vmatpush.msra.mxu2 %v224_v23  ;;  %165 = vmatpush.msra.mxu1 %v150_v38 }
  0x25   :  { %92 = vmatpush.msra.mxu0 %v65_v20 }
  0x26   :  { %250 = vmatpush.msra.mxu2 %v223_v25  ;;  %166 = vmatpush.msra.mxu1 %v149_v39  ;;  %v600_v25 = vld [vmem:[#allocation7 + $0x6] ss:$0 sm:$0xff] }
  0x27   :  { %93 = vmatpush.msra.mxu0 %v64_v22 }
  0x28   :  { %251 = vmatpush.msra.mxu2 %v222_v27  ;;  %167 = vmatpush.msra.mxu1 %v148_v40 }
  0x29   :  { %94 = vmatpush.msra.mxu0 %v63_v24 }
  0x2a   :  { %252 = vmatpush.msra.mxu2 %v221_v30  ;;  %168 = vmatpush.msra.mxu1 %v147_v42  ;;  %v314_v42 = vld [vmem:[#allocation5 + $0x1f8] sm:$0xff] }
  0x2b   :  { %95 = vmatpush.msra.mxu0 %v62_v26  ;;  %319 = vmatpush.msra.mxu3 %v314_v42 }
  0x2c   :  { %253 = vmatpush.msra.mxu2 %v220_v31  ;;  %169 = vmatpush.msra.mxu1 %v146_v43  ;;  %v313_v43 = vld [vmem:[#allocation5 + $0x1f0] sm:$0xff] }
  0x2d   :  { %96 = vmatpush.msra.mxu0 %v61_v28  ;;  %320 = vmatpush.msra.mxu3 %v313_v43  ;;  %v237_v43 = vld [vmem:[#allocation7 + $0x8] sm:$0x1] }
  0x2e   :  { %97 = vmatmul.f32.vlgmr.msra.gmra.mxu0 %v60_v29  ;;  %254 = vmatpush.msra.mxu2 %v219_v32 }
  0x2f   :  { %255 = vmatmul.f32.vlgmr.msra.gmra.mxu2 %v60_v29  ;;  %170 = vmatpush.msra.mxu1 %v145_v46 }
  0x31   :  { %171 = vmatpush.msra.mxu1 %v144_v48  ;;  %v310_v48 = vld [vmem:[#allocation5 + $0x1d8] sm:$0xff] }
  0x33   :  { %172 = vmatpush.msra.mxu1 %v143_v50 }
  0x35   :  { %173 = vmatpush.msra.mxu1 %v142_v53 }
  0x37   :  { %174 = vmatpush.msra.mxu1 %v141_v56  ;;  %v306_v56 = vld [vmem:[#allocation5 + $0x1b8] sm:$0xff] }
  0x39   :  { %175 = vmatpush.msra.mxu1 %v140_v58 }
  0xab   :  { %v98_v44 = vpop.f32.mrf.mxu0 }
  0xac   :  { %v99_v45 = vadd.f32 %v599_v41, %v98_v44  ;;  %v312_v44 = vld [vmem:[#allocation5 + $0x1e8] sm:$0xff] }
  0xad   :  { %321 = vmatpush.msra.mxu3 %v312_v44 }
  0xae   :  { %v101_v47 = vmul.f32 0.01, %v99_v45 }
  0xb0   :  { %v102_v49 = vmax.f32 %v99_v45, %v101_v47  ;;  %v311_v47 = vld [vmem:[#allocation5 + $0x1e0] sm:$0xff] }
  0xb1   :  { %322 = vmatpush.msra.mxu3 %v311_v47 }
  0xb2   :  { %v103_v51 = vrot.slane %v102_v49, 4  ;;  %v110_v52 = vmul.f32 %v102_v49, %v102_v49  ;;  %v256_v26 = vpop.f32.mrf.mxu2 }
  0xb3   :  { %v257_v27 = vadd.f32 %v600_v25, %v256_v26  ;;  %323 = vmatpush.msra.mxu3 %v310_v48 }
  0xb4   :  { %v104_v54 = vadd.f32 %v103_v51, %v102_v49  ;;  %v111_v55 = vrot.slane %v110_v52, 4  ;;  %v309_v51 = vld [vmem:[#allocation5 + $0x1d0] sm:$0xff] }
  0xb5   :  { %v259_v28 = vmul.f32 0.01, %v257_v27  ;;  %324 = vmatpush.msra.mxu3 %v309_v51 }
  0xb6   :  { %v112_v57 = vadd.f32 %v111_v55, %v110_v52  ;;  %v105_v59 = vrot.slane %v104_v54, 2  ;;  %v308_v52 = vld [vmem:[#allocation5 + $0x1c8] sm:$0xff]  ;;  %v307_v55 = vld [vmem:[#allocation5 + $0x1c0] sm:$0xff] }
  0xb7   :  { %v755_v29 = vmax.f32 %v257_v27, %v259_v28  ;;  %325 = vmatpush.msra.mxu3 %v308_v52 }
  0xb8   :  { %v113_v60 = vrot.slane %v112_v57, 2  ;;  %v106_v61 = vadd.f32 %v105_v59, %v104_v54  ;;  %v601_v54 = vld [vmem:[#allocation7 + $0x3] ss:$0 sm:$0xff] }
  0xb9   :  { %v261_v30 = vrot.slane %v755_v29, 4  ;;  %v268_v31 = vmul.f32 %v755_v29, %v755_v29  ;;  %326 = vmatpush.msra.mxu3 %v307_v55 }
  0xba   :  { %v114_v62 = vadd.f32 %v113_v60, %v112_v57  ;;  %v107_v63 = vrot.slane %v106_v61, 1  ;;  %v305_v60 = vld [vmem:[#allocation5 + $0x1b0] sm:$0xff] }
  0xbb   :  { %v262_v32 = vadd.f32 %v261_v30, %v755_v29  ;;  %v269_v33 = vrot.slane %v268_v31, 4  ;;  %327 = vmatpush.msra.mxu3 %v306_v56 }
  0xbc   :  { %v108_v0 = vadd.f32 %v107_v63, %v106_v61  ;;  %v115_v1 = vrot.slane %v114_v62, 1 }
  0xbd   :  { %v263_v34 = vrot.slane %v262_v32, 2  ;;  %v270_v35 = vadd.f32 %v269_v33, %v268_v31  ;;  %328 = vmatpush.msra.mxu3 %v305_v60  ;;  %v392_v60 = vld [vmem:[#allocation5 + $0x270] sm:$0xff] }
  0xbe   :  { %v109_v2 = vmul.f32 0.125, %v108_v0  ;;  %v116_v3 = vadd.f32 %v115_v1, %v114_v62  ;;  %v304_v62 = vld [vmem:[#allocation5 + $0x1a8] sm:$0xff]  ;;  %v303_v1 = vld [vmem:[#allocation5 + $0x1a0] sm:$0xff] }
  0xbf   :  { %v271_v36 = vrot.slane %v270_v35, 2  ;;  %v264_v37 = vadd.f32 %v263_v34, %v262_v32  ;;  %329 = vmatpush.msra.mxu3 %v304_v62  ;;  %v236_v34 = vld [vmem:[#allocation7 + $0x7] sm:$0x1] }
  0xc0   :  { %v117_v4 = vmul.f32 0.125, %v116_v3  ;;  %v118_v5 = vmul.f32 %v109_v2, %v109_v2  ;;  %v390_v62 = vld [vmem:[#allocation5 + $0x260] sm:$0xff] }
  0xc1   :  { %v272_v38 = vadd.f32 %v271_v36, %v270_v35  ;;  %v265_v39 = vrot.slane %v264_v37, 1  ;;  %330 = vmatpush.msra.mxu3 %v303_v1  ;;  %v388_v1 = vld [vmem:[#allocation5 + $0x250] sm:$0xff] }
  0xc2   :  { %v119_v6 = vsub.f32 %v117_v4, %v118_v5  ;;  %v302_v4 = vld [vmem:[#allocation5 + $0x198] sm:$0xff] }
  0xc3   :  { %v273_v40 = vrot.slane %v272_v38, 1  ;;  %v266_v41 = vadd.f32 %v265_v39, %v264_v37  ;;  %331 = vmatpush.msra.mxu3 %v302_v4 }
  0xc4   :  { %v120_v7 = vmax.f32 %v119_v6, 0.0 }
  0xc5   :  { %v761_v45 = vmul.f32 0.125, %v266_v41  ;;  %v274_v46 = vadd.f32 %v273_v40, %v272_v38  ;;  %v157_v41 = vld [vmem:[#allocation7 + $0x4] sm:$0x1] }
  0xc6   :  { %v121_v8 = vadd.f32 1e-05, %v120_v7  ;;  %v301_v7 = vld [vmem:[#allocation5 + $0x190] sm:$0xff] }
  0xc7   :  { %v276_v50 = vmul.f32 %v761_v45, %v761_v45  ;;  %332 = vmatpush.msra.mxu3 %v301_v7  ;;  %v384_v7 = vld [vmem:[#allocation5 + $0x230] sm:$0xff] }
  0xc8   :  { %606 = vrsqrt.f32 %v121_v8  ;;  %vm128_vm1 = vweird.f32 %v121_v8 }
  0xce   :  { %v607_v9 = vpop.eup %606 }
  0xcf   :  { %v123_v10 = vmul.f32 %v607_v9, %v121_v8  ;;  %vm129_vm0 = vweird.f32 %v607_v9 }
  0xd0   :  { %vm130_vm2 = vmor %vm128_vm1, %vm129_vm0 }
  0xd1   :  { %v124_v11 = vmul.f32 %v607_v9, %v123_v10  ;;  %v300_v10 = vld [vmem:[#allocation5 + $0x188] sm:$0xff] }
  0xd2   :  { %333 = vmatpush.msra.mxu3 %v300_v10 }
  0xd3   :  { %v125_v12 = vmul.f32 0.5, %v124_v11 }
  0xd5   :  { %v126_v13 = vsub.f32 1.5, %v125_v12 }
  0xd7   :  { %v127_v15 = vmul.f32 %v607_v9, %v126_v13  ;;  %v299_v13 = vld [vmem:[#allocation5 + $0x180] sm:$0xff] }
  0xd8   :  { %334 = vmatpush.msra.mxu3 %v299_v13 }
  0xd9   :  { %v131_v16 = vsel %vm130_vm2, %v607_v9, %v127_v15 }
  0xda   :  { %v132_v17 = vmul.f32 %v131_v16, %v78_v14 }
  0xdc   :  { %v133_v19 = vmul.f32 %v132_v17, %v109_v2  ;;  %v135_v20 = vperm.slane %v132_v17, 0 }
  0xde   :  { %v134_v21 = vsub.f32 %v79_v18, %v133_v19  ;;  %v136_v22 = vmul.f32 %v135_v20, %v102_v49  ;;  %v275_v49 = vmul.f32 0.125, %v274_v46 }
  0xe0   :  { %v137_v23 = vperm.slane %v134_v21, 0  ;;  %v277_v53 = vsub.f32 %v275_v49, %v276_v50  ;;  %v158_v49 = vld [vmem:[#allocation7 + $0x5] sm:$0x1] }
  0xe2   :  { %v138_v24 = vadd.f32 %v137_v23, %v136_v22  ;;  %v278_v57 = vmax.f32 %v277_v53, 0.0 }
  0xe4   :  { %176 = vmatmul.f32.vlgmr.msra.gmra.mxu1 %v138_v24  ;;  %v279_v63 = vadd.f32 1e-05, %v278_v57 }
  0xe6   :  { %608 = vrsqrt.f32 %v279_v63  ;;  %vm286_vm3 = vweird.f32 %v279_v63 }
  0xec   :  { %v609_v11 = vpop.eup %608 }
  0xed   :  { %v281_v17 = vmul.f32 %v609_v11, %v279_v63  ;;  %vm287_vm4 = vweird.f32 %v609_v11  ;;  %v389_v63 = vld [vmem:[#allocation5 + $0x258] sm:$0xff] }
  0xee   :  { %vm288_vm5 = vmor %vm286_vm3, %vm287_vm4 }
  0xef   :  { %v282_v22 = vmul.f32 %v609_v11, %v281_v17 }
  0xf1   :  { %v283_v26 = vmul.f32 0.5, %v282_v22 }
  0xf3   :  { %v284_v30 = vsub.f32 1.5, %v283_v26 }
  0xf5   :  { %v285_v31 = vmul.f32 %v609_v11, %v284_v30 }
  0xf7   :  { %v289_v35 = vsel %vm288_vm5, %v609_v11, %v285_v31 }
  0xf8   :  { %v290_v37 = vmul.f32 %v289_v35, %v236_v34 }
  0xfa   :  { %v291_v40 = vmul.f32 %v290_v37, %v761_v45  ;;  %v293_v48 = vperm.slane %v290_v37, 0 }
  0xfc   :  { %v292_v47 = vsub.f32 %v237_v43, %v291_v40  ;;  %v294_v53 = vmul.f32 %v293_v48, %v755_v29  ;;  %v602_v29 = vld [vmem:[#allocation7 + $0x9] ss:$0 sm:$0xff]  ;;  %v316_v40 = vld [vmem:[#allocation7 + $0xa] sm:$0x1] }
 0x161   :  { %v177_v58 = vpop.f32.mrf.mxu1 }
 0x162   :  { %v178_v59 = vadd.f32 %v601_v54, %v177_v58  ;;  %v295_v54 = vperm.slane %v292_v47, 0 }
 0x164   :  { %v180_v61 = vmul.f32 0.01, %v178_v59  ;;  %v296_v57 = vadd.f32 %v295_v54, %v294_v53  ;;  %v471_v53 = vld [vmem:[#allocation5 + $0x2f0] sm:$0xff]  ;;  %v470_v54 = vld [vmem:[#allocation5 + $0x2e8] sm:$0xff] }
 0x166   :  { %v765_v0 = vmax.f32 %v178_v59, %v180_v61  ;;  %v393_v59 = vld [vmem:[#allocation5 + $0x278] sm:$0xff]  ;;  %v391_v61 = vld [vmem:[#allocation5 + $0x268] sm:$0xff] }
 0x167   :  { %398 = vmatpush.msrb.mxu0 %v393_v59  ;;  %v465_v59 = vld [vmem:[#allocation5 + $0x2c0] sm:$0xff] }
 0x168   :  { %v182_v2 = vrot.slane %v765_v0, 4  ;;  %v189_v3 = vmul.f32 %v765_v0, %v765_v0 }
 0x169   :  { %399 = vmatpush.msrb.mxu0 %v392_v60 }
 0x16a   :  { %v183_v5 = vadd.f32 %v182_v2, %v765_v0  ;;  %v190_v6 = vrot.slane %v189_v3, 4  ;;  %v387_v2 = vld [vmem:[#allocation5 + $0x248] sm:$0xff] }
 0x16b   :  { %400 = vmatpush.msrb.mxu0 %v391_v61 }
 0x16c   :  { %v184_v8 = vrot.slane %v183_v5, 2  ;;  %v191_v9 = vadd.f32 %v190_v6, %v189_v3 }
 0x16d   :  { %401 = vmatpush.msrb.mxu0 %v390_v62  ;;  %v464_v62 = vld [vmem:[#allocation5 + $0x2b8] sm:$0xff] }
 0x16e   :  { %v192_v12 = vrot.slane %v191_v9, 2  ;;  %v185_v14 = vadd.f32 %v184_v8, %v183_v5  ;;  %v385_v5 = vld [vmem:[#allocation5 + $0x238] sm:$0xff] }
 0x16f   :  { %402 = vmatpush.msrb.mxu0 %v389_v63 }
 0x170   :  { %v193_v15 = vadd.f32 %v192_v12, %v191_v9  ;;  %v186_v16 = vrot.slane %v185_v14, 1  ;;  %v383_v9 = vld [vmem:[#allocation5 + $0x228] sm:$0xff]  ;;  %v382_v12 = vld [vmem:[#allocation5 + $0x220] sm:$0xff] }
 0x171   :  { %403 = vmatpush.msrb.mxu0 %v388_v1  ;;  %v463_v1 = vld [vmem:[#allocation5 + $0x2b0] sm:$0xff] }
 0x172   :  { %v194_v18 = vrot.slane %v193_v15, 1  ;;  %v187_v19 = vadd.f32 %v186_v16, %v185_v14 }
 0x173   :  { %404 = vmatpush.msrb.mxu0 %v387_v2  ;;  %v462_v2 = vld [vmem:[#allocation5 + $0x2a8] sm:$0xff] }
 0x174   :  { %v188_v20 = vmul.f32 0.125, %v187_v19  ;;  %v195_v21 = vadd.f32 %v194_v18, %v193_v15  ;;  %v381_v15 = vld [vmem:[#allocation5 + $0x218] sm:$0xff]  ;;  %v380_v18 = vld [vmem:[#allocation5 + $0x210] sm:$0xff] }
 0x176   :  { %v196_v23 = vmul.f32 0.125, %v195_v21  ;;  %v197_v24 = vmul.f32 %v188_v20, %v188_v20  ;;  %v379_v21 = vld [vmem:[#allocation5 + $0x208] sm:$0xff] }
 0x178   :  { %v198_v25 = vsub.f32 %v196_v23, %v197_v24  ;;  %v378_v23 = vld [vmem:[#allocation5 + $0x200] sm:$0xff] }
 0x17a   :  { %v199_v27 = vmax.f32 %v198_v25, 0.0 }
 0x17c   :  { %v200_v28 = vadd.f32 1e-05, %v199_v27 }
 0x17e   :  { %610 = vrsqrt.f32 %v200_v28  ;;  %vm207_vm7 = vweird.f32 %v200_v28 }
 0x184   :  { %v611_v32 = vpop.eup %610 }
 0x185   :  { %v202_v33 = vmul.f32 %v611_v32, %v200_v28  ;;  %vm208_vm6 = vweird.f32 %v611_v32 }
 0x186   :  { %vm209_vm8 = vmor %vm207_vm7, %vm208_vm6 }
 0x187   :  { %v203_v36 = vmul.f32 %v611_v32, %v202_v33 }
 0x189   :  { %v204_v38 = vmul.f32 0.5, %v203_v36 }
 0x18b   :  { %v205_v39 = vsub.f32 1.5, %v204_v38 }
 0x18d   :  { %v206_v42 = vmul.f32 %v611_v32, %v205_v39 }
 0x18f   :  { %v210_v44 = vsel %vm209_vm8, %v611_v32, %v206_v42 }
 0x190   :  { %v211_v46 = vmul.f32 %v210_v44, %v157_v41  ;;  %v317_v44 = vld [vmem:[#allocation7 + $0xb] sm:$0x1] }
 0x192   :  { %v212_v50 = vmul.f32 %v211_v46, %v188_v20  ;;  %v214_v51 = vperm.slane %v211_v46, 0 }
 0x194   :  { %v213_v52 = vsub.f32 %v158_v49, %v212_v50  ;;  %v215_v55 = vmul.f32 %v214_v51, %v765_v0  ;;  %v386_v0 = vld [vmem:[#allocation5 + $0x240] sm:$0xff] }
 0x195   :  { %405 = vmatpush.msrb.mxu0 %v386_v0 }
 0x196   :  { %v216_v56 = vperm.slane %v213_v52, 0  ;;  %v472_v52 = vld [vmem:[#allocation5 + $0x2f8] sm:$0xff] }
 0x197   :  { %406 = vmatpush.msrb.mxu0 %v385_v5  ;;  %477 = vmatpush.msrb.mxu1 %v472_v52  ;;  %v544_v52 = vld [vmem:[#allocation5 + $0x340] sm:$0xff] }
 0x198   :  { %v217_v45 = vadd.f32 %v216_v56, %v215_v55  ;;  %v469_v55 = vld [vmem:[#allocation5 + $0x2e0] sm:$0xff]  ;;  %v468_v56 = vld [vmem:[#allocation5 + $0x2d8] sm:$0xff] }
 0x199   :  { %407 = vmatpush.msrb.mxu0 %v384_v7  ;;  %478 = vmatpush.msrb.mxu1 %v471_v53  ;;  %v460_v7 = vld [vmem:[#allocation5 + $0x298] sm:$0xff] }
 0x19a   :  { %v297_v58 = vadd.f32 %v296_v57, %v217_v45  ;;  %v467_v45 = vld [vmem:[#allocation5 + $0x2d0] sm:$0xff]  ;;  %v603_v57 = vld [vmem:[#allocation7 + $0xc] ss:$0 sm:$0xff] }
 0x19b   :  { %408 = vmatpush.msrb.mxu0 %v383_v9  ;;  %479 = vmatpush.msrb.mxu1 %v470_v54 }
 0x19c   :  { %335 = vmatmul.f32.vlgmr.msra.gmra.mxu3 %v297_v58  ;;  %v466_v58 = vld [vmem:[#allocation5 + $0x2c8] sm:$0xff] }
 0x19d   :  { %409 = vmatpush.msrb.mxu0 %v382_v12  ;;  %480 = vmatpush.msrb.mxu1 %v469_v55  ;;  %v543_v55 = vld [vmem:[#allocation5 + $0x338] sm:$0xff] }
 0x19f   :  { %410 = vmatpush.msrb.mxu0 %v381_v15  ;;  %481 = vmatpush.msrb.mxu1 %v468_v56  ;;  %v457_v15 = vld [vmem:[#allocation5 + $0x280] sm:$0xff] }
 0x1a1   :  { %411 = vmatpush.msrb.mxu0 %v380_v18  ;;  %482 = vmatpush.msrb.mxu1 %v467_v45  ;;  %v542_v45 = vld [vmem:[#allocation5 + $0x330] sm:$0xff] }
 0x1a3   :  { %412 = vmatpush.msrb.mxu0 %v379_v21  ;;  %483 = vmatpush.msrb.mxu1 %v466_v58  ;;  %v541_v58 = vld [vmem:[#allocation5 + $0x328] sm:$0xff] }
 0x1a5   :  { %413 = vmatpush.msrb.mxu0 %v378_v23  ;;  %484 = vmatpush.msrb.mxu1 %v465_v59 }
 0x1a7   :  { %485 = vmatpush.msrb.mxu1 %v464_v62 }
 0x1a9   :  { %486 = vmatpush.msrb.mxu1 %v463_v1  ;;  %v539_v1 = vld [vmem:[#allocation5 + $0x318] sm:$0xff] }
 0x1ab   :  { %487 = vmatpush.msrb.mxu1 %v462_v2 }
 0x21f   :  { %v336_v3 = vpop.f32.mrf.mxu3 }
 0x220   :  { %v337_v4 = vadd.f32 %v602_v29, %v336_v3 }
 0x222   :  { %v339_v6 = vmul.f32 0.01, %v337_v4 }
 0x224   :  { %v340_v8 = vmax.f32 %v337_v4, %v339_v6  ;;  %v461_v4 = vld [vmem:[#allocation5 + $0x2a0] sm:$0xff] }
 0x225   :  { %488 = vmatpush.msrb.mxu1 %v461_v4 }
 0x226   :  { %v341_v10 = vrot.slane %v340_v8, 4  ;;  %v348_v11 = vmul.f32 %v340_v8, %v340_v8 }
 0x227   :  { %489 = vmatpush.msrb.mxu1 %v460_v7  ;;  %v536_v7 = vld [vmem:[#allocation5 + $0x300] sm:$0xff] }
 0x228   :  { %v342_v13 = vadd.f32 %v341_v10, %v340_v8  ;;  %v349_v14 = vrot.slane %v348_v11, 4  ;;  %v459_v10 = vld [vmem:[#allocation5 + $0x290] sm:$0xff] }
 0x229   :  { %490 = vmatpush.msrb.mxu1 %v459_v10 }
 0x22a   :  { %v343_v16 = vrot.slane %v342_v13, 2  ;;  %v350_v17 = vadd.f32 %v349_v14, %v348_v11 }
 0x22c   :  { %v344_v19 = vadd.f32 %v343_v16, %v342_v13  ;;  %v351_v20 = vrot.slane %v350_v17, 2  ;;  %v458_v13 = vld [vmem:[#allocation5 + $0x288] sm:$0xff] }
 0x22d   :  { %491 = vmatpush.msrb.mxu1 %v458_v13 }
 0x22e   :  { %v352_v22 = vadd.f32 %v351_v20, %v350_v17  ;;  %v345_v24 = vrot.slane %v344_v19, 1 }
 0x22f   :  { %492 = vmatpush.msrb.mxu1 %v457_v15 }
 0x230   :  { %v353_v25 = vrot.slane %v352_v22, 1  ;;  %v346_v26 = vadd.f32 %v345_v24, %v344_v19 }
 0x232   :  { %v354_v27 = vadd.f32 %v353_v25, %v352_v22  ;;  %v347_v28 = vmul.f32 0.125, %v346_v26 }
 0x234   :  { %v355_v30 = vmul.f32 0.125, %v354_v27  ;;  %v356_v31 = vmul.f32 %v347_v28, %v347_v28 }
 0x236   :  { %v357_v32 = vsub.f32 %v355_v30, %v356_v31 }
 0x238   :  { %v358_v33 = vmax.f32 %v357_v32, 0.0  ;;  %v395_v32 = vld [vmem:[#allocation7 + $0xd] sm:$0x1] }
 0x23a   :  { %v359_v34 = vadd.f32 1e-05, %v358_v33 }
 0x23c   :  { %612 = vrsqrt.f32 %v359_v34  ;;  %vm366_vm10 = vweird.f32 %v359_v34 }
 0x242   :  { %v613_v35 = vpop.eup %612 }
 0x243   :  { %v361_v36 = vmul.f32 %v613_v35, %v359_v34  ;;  %vm367_vm9 = vweird.f32 %v613_v35 }
 0x244   :  { %vm368_vm11 = vmor %vm366_vm10, %vm367_vm9 }
 0x245   :  { %v362_v37 = vmul.f32 %v613_v35, %v361_v36  ;;  %v396_v36 = vld [vmem:[#allocation7 + $0xe] sm:$0x1] }
 0x247   :  { %v363_v38 = vmul.f32 0.5, %v362_v37 }
 0x249   :  { %v364_v39 = vsub.f32 1.5, %v363_v38 }
 0x24b   :  { %v365_v41 = vmul.f32 %v613_v35, %v364_v39 }
 0x24d   :  { %v369_v42 = vsel %vm368_vm11, %v613_v35, %v365_v41 }
 0x24e   :  { %v370_v43 = vmul.f32 %v369_v42, %v316_v40 }
 0x250   :  { %v371_v46 = vmul.f32 %v370_v43, %v347_v28  ;;  %v373_v47 = vperm.slane %v370_v43, 0  ;;  %v551_v43 = vld [vmem:[#allocation5 + $0x378] sm:$0xff] }
 0x251   :  { %554 = vmatpush.msrb.mxu2 %v551_v43 }
 0x252   :  { %v372_v48 = vsub.f32 %v317_v44, %v371_v46  ;;  %v374_v49 = vmul.f32 %v373_v47, %v340_v8  ;;  %v550_v44 = vld [vmem:[#allocation5 + $0x370] sm:$0xff]  ;;  %v549_v46 = vld [vmem:[#allocation5 + $0x368] sm:$0xff]  ;;  %v548_v47 = vld [vmem:[#allocation5 + $0x360] sm:$0xff] }
 0x253   :  { %555 = vmatpush.msrb.mxu2 %v550_v44 }
 0x254   :  { %v375_v50 = vperm.slane %v372_v48, 0  ;;  %v547_v48 = vld [vmem:[#allocation5 + $0x358] sm:$0xff] }
 0x255   :  { %556 = vmatpush.msrb.mxu2 %v549_v46 }
 0x256   :  { %v376_v51 = vadd.f32 %v375_v50, %v374_v49  ;;  %v546_v49 = vld [vmem:[#allocation5 + $0x350] sm:$0xff]  ;;  %v604_v50 = vld [vmem:[#allocation7 + $0xf] ss:$0 sm:$0xff] }
 0x257   :  { %557 = vmatpush.msrb.mxu2 %v548_v47 }
 0x258   :  { %414 = vmatmul.f32.vlgmr.msrb.gmra.mxu0 %v376_v51  ;;  %v545_v51 = vld [vmem:[#allocation5 + $0x348] sm:$0xff] }
 0x259   :  { %558 = vmatpush.msrb.mxu2 %v547_v48 }
 0x25b   :  { %559 = vmatpush.msrb.mxu2 %v546_v49 }
 0x25d   :  { %560 = vmatpush.msrb.mxu2 %v545_v51 }
 0x25f   :  { %561 = vmatpush.msrb.mxu2 %v544_v52 }
 0x261   :  { %562 = vmatpush.msrb.mxu2 %v543_v55 }
 0x263   :  { %563 = vmatpush.msrb.mxu2 %v542_v45 }
 0x265   :  { %564 = vmatpush.msrb.mxu2 %v541_v58 }
 0x2d5   :  { %v415_v60 = vpop.f32.mrf.mxu0 }
 0x2d6   :  { %v416_v61 = vadd.f32 %v603_v57, %v415_v60 }
 0x2d8   :  { %v418_v63 = vmul.f32 0.01, %v416_v61 }
 0x2da   :  { %v419_v29 = vmax.f32 %v416_v61, %v418_v63  ;;  %v540_v61 = vld [vmem:[#allocation5 + $0x320] sm:$0xff] }
 0x2db   :  { %565 = vmatpush.msrb.mxu2 %v540_v61 }
 0x2dc   :  { %v420_v0 = vrot.slane %v419_v29, 4  ;;  %v427_v3 = vmul.f32 %v419_v29, %v419_v29 }
 0x2dd   :  { %566 = vmatpush.msrb.mxu2 %v539_v1 }
 0x2de   :  { %v421_v5 = vadd.f32 %v420_v0, %v419_v29  ;;  %v428_v6 = vrot.slane %v427_v3, 4  ;;  %v538_v0 = vld [vmem:[#allocation5 + $0x310] sm:$0xff] }
 0x2df   :  { %567 = vmatpush.msrb.mxu2 %v538_v0 }
 0x2e0   :  { %v422_v8 = vrot.slane %v421_v5, 2  ;;  %v429_v9 = vadd.f32 %v428_v6, %v427_v3 }
 0x2e2   :  { %v423_v11 = vadd.f32 %v422_v8, %v421_v5  ;;  %v430_v12 = vrot.slane %v429_v9, 2  ;;  %v537_v5 = vld [vmem:[#allocation5 + $0x308] sm:$0xff] }
 0x2e3   :  { %568 = vmatpush.msrb.mxu2 %v537_v5 }
 0x2e4   :  { %v431_v14 = vadd.f32 %v430_v12, %v429_v9  ;;  %v424_v16 = vrot.slane %v423_v11, 1 }
 0x2e5   :  { %569 = vmatpush.msrb.mxu2 %v536_v7 }
 0x2e6   :  { %v432_v17 = vrot.slane %v431_v14, 1  ;;  %v425_v18 = vadd.f32 %v424_v16, %v423_v11 }
 0x2e8   :  { %v433_v19 = vadd.f32 %v432_v17, %v431_v14  ;;  %v426_v20 = vmul.f32 0.125, %v425_v18 }
 0x2ea   :  { %v434_v21 = vmul.f32 0.125, %v433_v19  ;;  %v435_v22 = vmul.f32 %v426_v20, %v426_v20 }
 0x2ec   :  { %v436_v23 = vsub.f32 %v434_v21, %v435_v22 }
 0x2ee   :  { %v437_v24 = vmax.f32 %v436_v23, 0.0  ;;  %v474_v23 = vld [vmem:[#allocation7 + $0x10] sm:$0x1] }
 0x2f0   :  { %v438_v25 = vadd.f32 1e-05, %v437_v24 }
 0x2f2   :  { %614 = vrsqrt.f32 %v438_v25  ;;  %vm445_vm13 = vweird.f32 %v438_v25 }
 0x2f8   :  { %v615_v26 = vpop.eup %614 }
 0x2f9   :  { %v440_v27 = vmul.f32 %v615_v26, %v438_v25  ;;  %vm446_vm12 = vweird.f32 %v615_v26 }
 0x2fa   :  { %vm447_vm14 = vmor %vm445_vm13, %vm446_vm12 }
 0x2fb   :  { %v441_v28 = vmul.f32 %v615_v26, %v440_v27  ;;  %v475_v27 = vld [vmem:[#allocation7 + $0x11] sm:$0x1] }
 0x2fd   :  { %v442_v30 = vmul.f32 0.5, %v441_v28 }
 0x2ff   :  { %v443_v31 = vsub.f32 1.5, %v442_v30 }
 0x301   :  { %v444_v33 = vmul.f32 %v615_v26, %v443_v31 }
 0x303   :  { %v448_v34 = vsel %vm447_vm14, %v615_v26, %v444_v33 }
 0x304   :  { %v449_v35 = vmul.f32 %v448_v34, %v395_v32 }
 0x306   :  { %v450_v37 = vmul.f32 %v449_v35, %v426_v20  ;;  %v452_v38 = vperm.slane %v449_v35, 0  ;;  %v605_v35 = vld [vmem:[#allocation7 + $0x12] ss:$0 sm:$0xff] }
 0x308   :  { %v451_v39 = vsub.f32 %v396_v36, %v450_v37  ;;  %v453_v40 = vmul.f32 %v452_v38, %v419_v29 }
 0x30a   :  { %v454_v41 = vperm.slane %v451_v39, 0 }
 0x30c   :  { %v455_v42 = vadd.f32 %v454_v41, %v453_v40 }
 0x30e   :  { %493 = vmatmul.f32.vlgmr.msrb.gmra.mxu1 %v455_v42 }
 0x38b   :  { %v494_v53 = vpop.f32.mrf.mxu1 }
 0x38c   :  { %v495_v54 = vadd.f32 %v604_v50, %v494_v53 }
 0x38e   :  { %v497_v56 = vmul.f32 0.01, %v495_v54 }
 0x390   :  { %v498_v57 = vmax.f32 %v495_v54, %v497_v56 }
 0x392   :  { %v499_v59 = vrot.slane %v498_v57, 4  ;;  %v506_v60 = vmul.f32 %v498_v57, %v498_v57 }
 0x394   :  { %v500_v62 = vadd.f32 %v499_v59, %v498_v57  ;;  %v507_v63 = vrot.slane %v506_v60, 4 }
 0x396   :  { %v501_v29 = vrot.slane %v500_v62, 2  ;;  %v508_v2 = vadd.f32 %v507_v63, %v506_v60 }
 0x398   :  { %v502_v3 = vadd.f32 %v501_v29, %v500_v62  ;;  %v509_v4 = vrot.slane %v508_v2, 2 }
 0x39a   :  { %v510_v6 = vadd.f32 %v509_v4, %v508_v2  ;;  %v503_v8 = vrot.slane %v502_v3, 1 }
 0x39c   :  { %v511_v9 = vrot.slane %v510_v6, 1  ;;  %v504_v10 = vadd.f32 %v503_v8, %v502_v3 }
 0x39e   :  { %v512_v11 = vadd.f32 %v511_v9, %v510_v6  ;;  %v505_v12 = vmul.f32 0.125, %v504_v10 }
 0x3a0   :  { %v513_v13 = vmul.f32 0.125, %v512_v11  ;;  %v514_v14 = vmul.f32 %v505_v12, %v505_v12 }
 0x3a2   :  { %v515_v15 = vsub.f32 %v513_v13, %v514_v14 }
 0x3a4   :  { %v516_v16 = vmax.f32 %v515_v15, 0.0 }
 0x3a6   :  { %v517_v17 = vadd.f32 1e-05, %v516_v16 }
 0x3a8   :  { %616 = vrsqrt.f32 %v517_v17  ;;  %vm524_vm0 = vweird.f32 %v517_v17 }
 0x3ae   :  { %v617_v18 = vpop.eup %616 }
 0x3af   :  { %v519_v19 = vmul.f32 %v617_v18, %v517_v17  ;;  %vm525_vm15 = vweird.f32 %v617_v18 }
 0x3b0   :  { %vm526_vm1 = vmor %vm524_vm0, %vm525_vm15 }
 0x3b1   :  { %v520_v20 = vmul.f32 %v617_v18, %v519_v19 }
 0x3b3   :  { %v521_v21 = vmul.f32 0.5, %v520_v20 }
 0x3b5   :  { %v522_v22 = vsub.f32 1.5, %v521_v21 }
 0x3b7   :  { %v523_v24 = vmul.f32 %v617_v18, %v522_v22 }
 0x3b9   :  { %v527_v25 = vsel %vm526_vm1, %v617_v18, %v523_v24 }
 0x3ba   :  { %v528_v26 = vmul.f32 %v527_v25, %v474_v23 }
 0x3bc   :  { %v529_v28 = vmul.f32 %v528_v26, %v505_v12  ;;  %v531_v30 = vperm.slane %v528_v26, 0 }
 0x3be   :  { %v530_v31 = vsub.f32 %v475_v27, %v529_v28  ;;  %v532_v32 = vmul.f32 %v531_v30, %v498_v57 }
 0x3c0   :  { %v533_v33 = vperm.slane %v530_v31, 0 }
 0x3c2   :  { %v534_v34 = vadd.f32 %v533_v33, %v532_v32 }
 0x3c4   :  { %570 = vmatmul.f32.vlgmr.msrb.gmra.mxu2 %v534_v34 }
 0x447   :  { %v571_v36 = vpop.f32.mrf.mxu2 }
 0x448   :  { %v572_v37 = vadd.f32 %v605_v35, %v571_v36 }
 0x44a   :  { %574 = vst [vmem:[#allocation8] sm:$0xff] %v572_v37 }
 0x44b   :  { %585 = dma.vmem_to_hbm [thread:$0]  %s581_s2, 128, %s583_s30, [#allocation4]  }
 0x44c   :  { %718 = dma.done.wait [#allocation4], 128  }
 0x44d   :  { %719 = vsyncadd [#allocation4], 4294967168 }
 0x44e   :  { %590 = vsyncpa [#allocation3], 1 }
 0x44f   :  { %591 = vsyncpa [#allocation6], 1 }
 0x450   :  { %592 = vsyncpa [#allocation4], 1 }

</bundles_post_ra>
